<compile_context>
chip_gen: v5e
topology: v5e:2x2
jax: 0.10.0
libtpu: 0.0.40
codegen_flags: <defaults>
</compile_context>

<pallas_src>
import functools

import jax
import jax.numpy as jnp
from jax.experimental import pallas as pl
from jax.experimental.pallas import tpu as pltpu

N_NODES = 72              # number of graph nodes
N_FEATS = 4               # dataset.num_node_features
FLAT = N_NODES * N_FEATS  # 288 — matches fc1 = Linear(288, 288)
HID1, HID2 = 6, 1         # GraphConv widths (dead branch, kept for fidelity)


def _round_up(x, m):
    return ((x + m - 1) // m) * m


# --------------------------------------------------------------------------- #
# Kernel
# --------------------------------------------------------------------------- #
def mlp_head_kernel(xf_ref, wfc1_ref, slab_ref, out_ref):
    """out = fc2(relu(fc1(xf)))  for xf of shape [M, 288].

    wfc1_ref: [288, 288] weights (bf16 or f32); matmul accumulates in f32.
    slab_ref: [3, 288] f32; row 0 = fc1 bias, row 1 = fc2 weight^T,
              row 2[0] = fc2 bias.
    """
    xf = xf_ref[...]                                    # [M, 288] f32
    w = wfc1_ref[...]                                   # [288, 288] bf16/f32
    bfc1 = slab_ref[0:1, :]                             # [1, 288] f32
    wfc2_t = slab_ref[1:2, :]                           # [1, 288] f32
    bfc2 = slab_ref[2:3, 0:1]                           # [1, 1]   f32

    # fc1 on the MXU: cast activations to the weight dtype (bf16-native on
    # v6e/v7x), accumulate in f32.  Bias + relu stay f32 on the VPU.
    h = jnp.dot(xf.astype(w.dtype), w, preferred_element_type=jnp.float32)
    h = jnp.maximum(h + bfc1, 0.0)

    # fc2: output width 1 -> VPU multiply + cross-lane (XLU) reduction instead
    # of an MXU matmul with N=1 (avoids an MXU push/pop round trip).
    out_ref[...] = jnp.sum(h * wfc2_t, axis=-1, keepdims=True) + bfc2


# --------------------------------------------------------------------------- #
# Parameters (packed ONCE at init — not per forward call)
# --------------------------------------------------------------------------- #
def init_params(key):
    """Deterministic synthetic parameters (shapes from Net.__init__).

    conv1/conv2 parameters are kept for fidelity with the module but are never
    used: the reference forward overwrites the GNN result with
    `x = data.x.float()`, so that branch is dead work.
    """
    ks = jax.random.split(key, 8)
    s = 0.05
    return {
        # GraphConv1/2 (dead branch — present only so the param set mirrors Net).
        "wr1": s * jax.random.normal(ks[0], (N_FEATS, HID1), jnp.float32),
        "wn1": s * jax.random.normal(ks[1], (N_FEATS, HID1), jnp.float32),
        "bc1": jnp.zeros((1, HID1), jnp.float32),
        "wr2": s * jax.random.normal(ks[2], (HID1, HID2), jnp.float32),
        "wn2": s * jax.random.normal(ks[3], (HID1, HID2), jnp.float32),
        "bc2": jnp.zeros((1, HID2), jnp.float32),
        # fc1: Linear(288, 288), fc2: Linear(288, 1)   (stored as [in, out]).
        "wfc1": s * jax.random.normal(ks[4], (FLAT, FLAT), jnp.float32),
        "bfc1": s * jax.random.normal(ks[5], (1, FLAT), jnp.float32),
        "wfc2": s * jax.random.normal(ks[6], (FLAT, 1), jnp.float32),
        "bfc2": s * jax.random.normal(ks[7], (1, 1), jnp.float32),
    }


def prepare_params(params, weights_dtype=jnp.bfloat16):
    """One-time packing (call at init, NOT per forward).

    Returns:
      wfc1: [288, 288] in `weights_dtype` (bf16 halves the dominant HBM
            transfer; compute still accumulates f32 in the kernel).
      slab: [3, 288] f32 — fc1 bias / fc2 weight^T / fc2 bias.  Kept f32: it is
            only 3.4 KB of traffic and keeps bias/fc2 math exact on the VPU.
    """
    wfc1 = params["wfc1"].astype(weights_dtype)
    bfc1 = params["bfc1"].reshape(1, FLAT)
    wfc2_t = params["wfc2"].reshape(1, FLAT)           # [288,1] column -> row
    bfc2_row = jnp.zeros((1, FLAT), jnp.float32).at[0, 0].set(
        params["bfc2"].reshape(()))
    slab = jnp.concatenate([bfc1, wfc2_t, bfc2_row], axis=0).astype(jnp.float32)
    return jax.device_put(wfc1), jax.device_put(slab)


# --------------------------------------------------------------------------- #
# Forward wrappers
# --------------------------------------------------------------------------- #
def net_forward(x, edge_index, wfc1, slab):
    """Pallas implementation of Net.forward for one graph. Returns shape [1].

    Single graph is launch-bound by construction (~166 KFLOPs vs. one launch +
    one weight DMA); prefer `net_forward_batched` whenever >1 graph is
    available so the weight fetch and launch are amortized.
    """
    del edge_index  # GNN branch is discarded by the reference forward (dead).
    xf = x.astype(jnp.float32).reshape(1, FLAT)
    vmem = pl.BlockSpec(memory_space=pltpu.MemorySpace.VMEM)
    w_bytes = FLAT * FLAT * jnp.dtype(wfc1.dtype).itemsize
    out = pl.pallas_call(
        mlp_head_kernel,
        out_shape=jax.ShapeDtypeStruct((1, 1), jnp.float32),
        in_specs=[vmem, vmem, vmem],
        out_specs=vmem,
        cost_estimate=pl.CostEstimate(
            flops=2 * FLAT * FLAT + 4 * FLAT,
            transcendentals=0,
            bytes_accessed=w_bytes + 4 * (4 * FLAT + 1)),
        # Single block, no grid: total footprint < 0.5 MB on every generation.
        compiler_params=pltpu.CompilerParams(vmem_limit_bytes=16 * 1024 * 1024),
    )(xf, wfc1, slab)
    return out.reshape(1)


def net_forward_batched(x_batch, wfc1, slab, *, block_m=None):
    """Batched forward over B graphs with one gridded pallas_call.

    fc1 weights and the param slab use a constant index_map so they stay
    resident in VMEM across grid steps.  Block-size heuristic:
      * small batches (B <= 32): one fat block — launch-bound either way,
      * larger batches: block_m = min(256, cdiv(B,2) rounded to 8) so blocks
        are fat (amortize ~0.35 µs/step, fill MXU rows) while keeping >=2
        "parallel" grid steps for v7x megacore sharding.
    Ragged B is handled by padding to a multiple of block_m.
    """
    B = x_batch.shape[0]
    if block_m is None:
        if B <= 32:
            block_m = _round_up(max(B, 8), 8)
        else:
            block_m = min(256, _round_up(pl.cdiv(B, 2), 8))
    assert block_m % 8 == 0

    xf = x_batch.astype(jnp.float32).reshape(B, FLAT)
    n_blocks = pl.cdiv(B, block_m)
    b_pad = n_blocks * block_m
    if b_pad != B:
        xf = jnp.pad(xf, ((0, b_pad - B), (0, 0)))

    w_bytes = FLAT * FLAT * jnp.dtype(wfc1.dtype).itemsize
    out = pl.pallas_call(
        mlp_head_kernel,
        out_shape=jax.ShapeDtypeStruct((b_pad, 1), jnp.float32),
        grid=(n_blocks,),
        in_specs=[pl.BlockSpec((block_m, FLAT), lambda b: (b, 0)),
                  pl.BlockSpec((FLAT, FLAT), lambda b: (0, 0)),
                  pl.BlockSpec((3, FLAT), lambda b: (0, 0))],
        out_specs=pl.BlockSpec((block_m, 1), lambda b: (b, 0)),
        cost_estimate=pl.CostEstimate(
            flops=2 * b_pad * FLAT * FLAT + 4 * b_pad * FLAT,
            transcendentals=0,
            bytes_accessed=w_bytes + 4 * (3 * FLAT + b_pad * FLAT + b_pad)),
        compiler_params=pltpu.CompilerParams(
            dimension_semantics=("parallel",),
            vmem_limit_bytes=16 * 1024 * 1024),
    )(xf, wfc1, slab)
    return out.reshape(b_pad)[:B]


# --------------------------------------------------------------------------- #
# References
# --------------------------------------------------------------------------- #
def net_forward_ref(x, edge_index, wfc1, slab):
    """Pure-JAX reference of the kernel math (same prepared params/quantization)."""
    del edge_index
    xf = x.astype(jnp.float32).reshape(-1, FLAT)
    xq = xf.astype(wfc1.dtype).astype(jnp.float32)   # mirror the kernel's MXU cast
    w = wfc1.astype(jnp.float32)
    hp = jax.lax.Precision.HIGHEST
    h = jnp.maximum(jnp.dot(xq, w, precision=hp) + slab[0:1, :], 0.0)
    return jnp.sum(h * slab[1:2, :], axis=-1) + slab[2, 0]


def net_forward_ref_f32(x, edge_index, params):
    """Pure-JAX f32 reference of the original module's live path."""
    del edge_index
    xf = x.astype(jnp.float32).reshape(1, FLAT)
    hp = jax.lax.Precision.HIGHEST
    h = jnp.maximum(
        jnp.dot(xf, params["wfc1"], precision=hp) + params["bfc1"], 0.0)
    return (jnp.dot(h, params["wfc2"], precision=hp) + params["bfc2"]).reshape(1)


# --------------------------------------------------------------------------- #
if __name__ == "__main__":
    key = jax.random.PRNGKey(0)
    k_x, k_p, k_b = jax.random.split(key, 3)

    # Node features [72, 4] -> flatten to 288 for the fc head.
    x = jax.random.normal(k_x, (N_NODES, N_FEATS), jnp.float32)

    # Ring graph, both directions (interface parity only: the reference forward
    # discards the GNN branch, so edge_index never influences the output).
    idx = jnp.arange(N_NODES, dtype=jnp.int32)
    nxt = (idx + 1) % N_NODES
    edge_index = jnp.stack([jnp.concatenate([idx, nxt]),
                            jnp.concatenate([nxt, idx])], axis=0)  # [2, 144]

    params = init_params(k_p)
    # Pack weights ONCE (bf16 weight tile + f32 bias/fc2 slab).
    wfc1_dev, slab_dev = prepare_params(params, weights_dtype=jnp.bfloat16)

    # --- single-graph forward (matches PyTorch Net.forward) ---
    out = jax.block_until_ready(net_forward(x, edge_index, wfc1_dev, slab_dev))
    ref = net_forward_ref(x, edge_index, wfc1_dev, slab_dev).reshape(1)
    ref32 = net_forward_ref_f32(x, edge_index, params)
    assert out.shape == (1,)
    # Tight check vs. the same bf16-quantized weights (validates kernel math).
    assert jnp.allclose(out, ref, atol=2e-3, rtol=2e-3), (out, ref)
    # Loose check vs. the original f32 module semantics (bf16 weight storage
    # introduces ~1e-2-scale deviation, as anticipated in the perf review).
    assert jnp.allclose(out, ref32, atol=5e-2, rtol=5e-2), (out, ref32)

    # --- batched forward: default heuristic (B=16 -> single fat block) ---
    B = 16
    x_batch = jax.random.normal(k_b, (B, N_NODES, N_FEATS), jnp.float32)
    out_b = jax.block_until_ready(
        net_forward_batched(x_batch, wfc1_dev, slab_dev))
    ref_b = jax.vmap(
        lambda xi: net_forward_ref(xi, edge_index, wfc1_dev, slab_dev)
    )(x_batch).reshape(B)
    assert out_b.shape == (B,)
    assert jnp.allclose(out_b, ref_b, atol=2e-3, rtol=2e-3), (out_b, ref_b)

    # --- batched forward: ragged batch + explicit 2-step "parallel" grid
    #     (exercises the cdiv/pad path and v7x megacore sharding) ---
    B2 = 13
    x_batch2 = x_batch[:B2]
    out_b2 = jax.block_until_ready(
        net_forward_batched(x_batch2, wfc1_dev, slab_dev, block_m=8))
    ref_b2 = ref_b[:B2]
    assert out_b2.shape == (B2,)
    assert jnp.allclose(out_b2, ref_b2, atol=2e-3, rtol=2e-3), (out_b2, ref_b2)

    print("KERNEL_OK")
</pallas_src>

<mosaic_0001>
module attributes {stable_mosaic.version = 11 : i64} {
  func.func @mlp_head_kernel(%arg0: memref<1x288xf32, #tpu.memory_space<vmem>>, %arg1: memref<288x288xbf16, #tpu.memory_space<vmem>>, %arg2: memref<3x288xf32, #tpu.memory_space<vmem>>, %arg3: memref<1x1xf32, #tpu.memory_space<vmem>>) attributes {dimension_semantics = [], scalar_prefetch = 0 : i64, scratch_operands = 0 : i64, tpu.core_type = #tpu.core_type<tc>} {
    %c0 = arith.constant 0 : index
    %c0_0 = arith.constant 0 : index
    %0 = vector.load %arg0[%c0, %c0_0] : memref<1x288xf32, #tpu.memory_space<vmem>>, vector<1x288xf32>
    %c0_1 = arith.constant 0 : index
    %c0_2 = arith.constant 0 : index
    %1 = vector.load %arg1[%c0_1, %c0_2] : memref<288x288xbf16, #tpu.memory_space<vmem>>, vector<288x288xbf16>
    %c0_3 = arith.constant 0 : index
    %c0_4 = arith.constant 0 : index
    %2 = vector.load %arg2[%c0_3, %c0_4] : memref<3x288xf32, #tpu.memory_space<vmem>>, vector<1x288xf32>
    %c1 = arith.constant 1 : index
    %c0_5 = arith.constant 0 : index
    %3 = vector.load %arg2[%c1, %c0_5] : memref<3x288xf32, #tpu.memory_space<vmem>>, vector<1x288xf32>
    %c2 = arith.constant 2 : index
    %c0_6 = arith.constant 0 : index
    %4 = vector.load %arg2[%c2, %c0_6] : memref<3x288xf32, #tpu.memory_space<vmem>>, vector<1x1xf32>
    %5 = arith.truncf %0 : vector<1x288xf32> to vector<1x288xbf16>
    %cst = arith.constant dense<0.000000e+00> : vector<1x288xf32>
    %6 = tpu.matmul %5, %1, %cst {dimension_numbers = #tpu.dot_dimension_numbers<[1], [0], [0], [1], [0, 0, 1, 1], [], []>} : vector<1x288xbf16>, vector<288x288xbf16>, vector<1x288xf32> -> vector<1x288xf32>
    %7 = arith.addf %6, %2 : vector<1x288xf32>
    %cst_7 = arith.constant 0.000000e+00 : f32
    %8 = vector.broadcast %cst_7 : f32 to vector<1x288xf32>
    %9 = arith.maximumf %7, %8 : vector<1x288xf32>
    %10 = arith.mulf %9, %3 : vector<1x288xf32>
    %cst_8 = arith.constant dense<0.000000e+00> : vector<1xf32>
    %11 = vector.multi_reduction <add>, %10, %cst_8 [1] : vector<1x288xf32> to vector<1xf32>
    %12 = vector.shape_cast %11 : vector<1xf32> to vector<1x1xf32>
    %13 = arith.addf %12, %4 : vector<1x1xf32>
    %c0_9 = arith.constant 0 : index
    %c0_10 = arith.constant 0 : index
    %14 = vector.load %arg3[%c0_9, %c0_10] : memref<1x1xf32, #tpu.memory_space<vmem>>, vector<1x1xf32>
    tpu.vector_store %arg3[%c0_9, %c0_10], %13 {strides = array<i32>} : memref<1x1xf32, #tpu.memory_space<vmem>>, vector<1x1xf32>,
    return
  }
}

</mosaic_0001>

<bundles_post_ra>
// kernel: tpu_custom_call.1
= control target key start
LH: loop header
LB: loop body
LE: loop exit
PB: predicated region body
PF: predicated region fallthrough
CT: control target
= control target key end

     0   :  { %8 = vsyncpa [#allocation3], 0  ;;  %s1047_s0 = inlined_call_operand.hbm [shape: f32[1,288], index: 0, kind: input, shape index: {}]   ;;  %s1048_s1 = inlined_call_operand.hbm [shape: bf16[288,288], index: 1, kind: input, shape index: {}]   ;;  %s1049_s2 = inlined_call_operand.hbm [shape: f32[3,288], index: 2, kind: input, shape index: {}]   ;;  %s1050_s3 = inlined_call_operand.hbm [shape: f32[1,1], index: 3, kind: output, shape index: {}]  }
   0x1   :  { %9 = vsyncpa [#allocation6], 0  ;;  %s26_s14 = sshll.u32 %s1048_s1, 4  ;;  %s27_s14 = int_to_ptr.hbm [resolvable:$true] %s26_s14 }
   0x2   :  { %10 = vsyncpa [#allocation4], 0  ;;  %s986_s15 = smov [#allocation5]   ;;  %s16_s19 = sshll.u32 %s1047_s0, 4  ;;  %s17_s19 = int_to_ptr.hbm [resolvable:$true] %s16_s19 }
   0x3   :  { %s28_s16 = sshll.u32 %s986_s15, 4  ;;  %s987_s20 = smov 192   ;;  %s29_s16 = int_to_ptr.vmem [resolvable:$true] %s28_s16 }
   0x4   :  { %s988_s21 = smov 12   ;;  %s989_s22 = smov [#allocation2]  }
   0x5   :  { %34 = dma.hbm_to_vmem [thread:$0]  %s27_s14, 6912, %s29_s16, [#allocation6], %s987_s20, %s987_s20, %s988_s21  }
   0x6   :  { %s18_s23 = sshll.u32 %s989_s22, 4  ;;  %s40_s26 = sshll.u32 %s1049_s2, 4  ;;  %s19_s23 = int_to_ptr.vmem [resolvable:$true] %s18_s23  ;;  %s41_s26 = int_to_ptr.hbm [resolvable:$true] %s40_s26 }
   0x7   :  { %21 = dma.hbm_to_vmem [thread:$0]  %s17_s19, 48, %s19_s23, [#allocation3]  }
   0x8   :  { %s990_s1 = smov [#allocation7]  }
   0x9   :  { %s42_s27 = sshll.u32 %s990_s1, 4  ;;  %s43_s27 = int_to_ptr.vmem [resolvable:$true] %s42_s27 }
   0xa   :  { %45 = dma.hbm_to_vmem [thread:$0]  %s41_s26, 192, %s43_s27, [#allocation6]  }
   0xb   :  { %980 = dma.done.wait [#allocation3], 48  }
   0xc   :  { %981 = vsyncadd [#allocation3], 4294967248 }
   0xd   :  { %982 = dma.done.wait [#allocation6], 7104  }
   0xe   :  { %983 = vsyncadd [#allocation6], 4294960192  ;;  %v691_v0 = vld [vmem:[#allocation5 + $0xa8] sm:$0xf]  ;;  %v846_v1 = vld [vmem:[#allocation5 + $0xb0] sm:$0xf0] }
   0xf   :  { %v787_v2 = vld [vmem:[#allocation5 + $0x168] sm:$0xf]  ;;  %v692_v3 = vor.u32 %v846_v1, %v691_v0  ;;  %v870_v4 = vld [vmem:[#allocation5 + $0x170] sm:$0xf0]  ;;  %v845_v5 = vld [vmem:[#allocation5 + $0xac] sm:$0xf] }
  0x10   :  { %v693_v6 = vld [vmem:[#allocation5 + $0xb4] sm:$0xf0]  ;;  %v788_v7 = vor.u32 %v870_v4, %v787_v2  ;;  %v876_v10 = vld [vmem:[#allocation5 + $0x1a0] sm:$0xf0]  ;;  %v679_v11 = vld [vmem:[#allocation5 + $0x90] sm:$0xf] }
  0x11   :  { %v696_v8 = vor.u32 %v845_v5, %v693_v6  ;;  %v811_v9 = vld [vmem:[#allocation5 + $0x198] sm:$0xf]  ;;  %445 = vmatpush.bf16.msra.mxu0 %v692_v3  ;;  %v843_v13 = vld [vmem:[#allocation5 + $0x98] sm:$0xf0]  ;;  %v775_v14 = vld [vmem:[#allocation5 + $0x150] sm:$0xf] }
  0x12   :  { %v812_v12 = vor.u32 %v876_v10, %v811_v9  ;;  %v867_v15 = vld [vmem:[#allocation5 + $0x158] sm:$0xf0]  ;;  %458 = vmatpush.bf16.msra.mxu1 %v788_v7  ;;  %v680_v16 = vor.u32 %v843_v13, %v679_v11  ;;  %v842_v18 = vld [vmem:[#allocation5 + $0x94] sm:$0xf]  ;;  %v681_v19 = vld [vmem:[#allocation5 + $0x9c] sm:$0xf0] }
  0x13   :  { %484 = vmatpush.bf16.msra.mxu3 %v696_v8  ;;  %v776_v17 = vor.u32 %v867_v15, %v775_v14  ;;  %v799_v20 = vld [vmem:[#allocation5 + $0x180] sm:$0xf]  ;;  %v684_v21 = vor.u32 %v842_v18, %v681_v19  ;;  %v873_v22 = vld [vmem:[#allocation5 + $0x188] sm:$0xf0]  ;;  %v789_v24 = vld [vmem:[#allocation5 + $0x174] sm:$0xf0] }
  0x14   :  { %477 = vmatpush.bf16.msra.mxu2 %v812_v12  ;;  %v869_v23 = vld [vmem:[#allocation5 + $0x16c] sm:$0xf]  ;;  %v800_v25 = vor.u32 %v873_v22, %v799_v20  ;;  %v667_v27 = vld [vmem:[#allocation5 + $0x78] sm:$0xf]  ;;  %v840_v28 = vld [vmem:[#allocation5 + $0x80] sm:$0xf0] }
  0x15   :  { %v792_v26 = vor.u32 %v869_v23, %v789_v24  ;;  %v763_v29 = vld [vmem:[#allocation5 + $0x138] sm:$0xf]  ;;  %446 = vmatpush.bf16.msra.mxu0 %v680_v16  ;;  %v668_v30 = vor.u32 %v840_v28, %v667_v27  ;;  %v864_v31 = vld [vmem:[#allocation5 + $0x140] sm:$0xf0]  ;;  %v839_v32 = vld [vmem:[#allocation5 + $0x7c] sm:$0xf] }
  0x16   :  { %v669_v33 = vld [vmem:[#allocation5 + $0x84] sm:$0xf0]  ;;  %459 = vmatpush.bf16.msra.mxu1 %v776_v17  ;;  %v764_v34 = vor.u32 %v864_v31, %v763_v29  ;;  %v866_v36 = vld [vmem:[#allocation5 + $0x154] sm:$0xf]  ;;  %v777_v37 = vld [vmem:[#allocation5 + $0x15c] sm:$0xf0] }
  0x17   :  { %485 = vmatpush.bf16.msra.mxu3 %v684_v21  ;;  %v672_v35 = vor.u32 %v839_v32, %v669_v33  ;;  %v655_v38 = vld [vmem:[#allocation5 + $0x60] sm:$0xf]  ;;  %v837_v39 = vld [vmem:[#allocation5 + $0x68] sm:$0xf0]  ;;  %v780_v42 = vor.u32 %v866_v36, %v777_v37  ;;  %v836_v43 = vld [vmem:[#allocation5 + $0x64] sm:$0xf] }
  0x18   :  { %478 = vmatpush.bf16.msra.mxu2 %v800_v25  ;;  %v751_v40 = vld [vmem:[#allocation5 + $0x120] sm:$0xf]  ;;  %v861_v41 = vld [vmem:[#allocation5 + $0x128] sm:$0xf0]  ;;  %v657_v44 = vld [vmem:[#allocation5 + $0x6c] sm:$0xf0]  ;;  %v656_v45 = vor.u32 %v837_v39, %v655_v38 }
  0x19   :  { %447 = vmatpush.bf16.msra.mxu0 %v668_v30  ;;  %v863_v46 = vld [vmem:[#allocation5 + $0x13c] sm:$0xf]  ;;  %v765_v47 = vld [vmem:[#allocation5 + $0x144] sm:$0xf0]  ;;  %v752_v48 = vor.u32 %v861_v41, %v751_v40  ;;  %v660_v49 = vor.u32 %v836_v43, %v657_v44  ;;  %v834_v51 = vld [vmem:[#allocation5 + $0x50] sm:$0xf0] }
  0x1a   :  { %460 = vmatpush.bf16.msra.mxu1 %v764_v34  ;;  %v643_v50 = vld [vmem:[#allocation5 + $0x48] sm:$0xf]  ;;  %v858_v53 = vld [vmem:[#allocation5 + $0x110] sm:$0xf0]  ;;  %v833_v54 = vld [vmem:[#allocation5 + $0x4c] sm:$0xf]  ;;  %v768_v56 = vor.u32 %v863_v46, %v765_v47 }
  0x1b   :  { %486 = vmatpush.bf16.msra.mxu3 %v672_v35  ;;  %v739_v52 = vld [vmem:[#allocation5 + $0x108] sm:$0xf]  ;;  %v645_v55 = vld [vmem:[#allocation5 + $0x54] sm:$0xf0]  ;;  %v860_v57 = vld [vmem:[#allocation5 + $0x124] sm:$0xf]  ;;  %v644_v58 = vor.u32 %v834_v51, %v643_v50 }
  0x1c   :  { %497 = vmatpush.bf16.msrb.mxu2 %v792_v26  ;;  %v753_v59 = vld [vmem:[#allocation5 + $0x12c] sm:$0xf0]  ;;  %v831_v61 = vld [vmem:[#allocation5 + $0x38] sm:$0xf0]  ;;  %v740_v62 = vor.u32 %v858_v53, %v739_v52  ;;  %v648_v63 = vor.u32 %v833_v54, %v645_v55  ;;  %v830_v3 = vld [vmem:[#allocation5 + $0x34] sm:$0xf] }
  0x1d   :  { %448 = vmatpush.bf16.msra.mxu0 %v656_v45  ;;  %v631_v60 = vld [vmem:[#allocation5 + $0x30] sm:$0xf]  ;;  %v855_v1 = vld [vmem:[#allocation5 + $0xf8] sm:$0xf0]  ;;  %v633_v4 = vld [vmem:[#allocation5 + $0x3c] sm:$0xf0]  ;;  %v756_v6 = vor.u32 %v860_v57, %v753_v59 }
  0x1e   :  { %461 = vmatpush.bf16.msra.mxu1 %v752_v48  ;;  %v727_v0 = vld [vmem:[#allocation5 + $0xf0] sm:$0xf]  ;;  %v1021_v2 = vld [vmem:[#allocation2] sm:$0x7]  ;;  %vm441_vm0 = vcmask 261120   ;;  %v632_v7 = vor.u32 %v831_v61, %v631_v60  ;;  %v636_v12 = vor.u32 %v830_v3, %v633_v4  ;;  %vm575_vm1 = vcmask 1040384  }
  0x1f   :  { %487 = vmatpush.bf16.msra.mxu3 %v660_v49  ;;  %v139_v5 = vperm.slane %v1021_v2, 2  ;;  %v857_v9 = vld [vmem:[#allocation5 + $0x10c] sm:$0xf]  ;;  %v741_v10 = vld [vmem:[#allocation5 + $0x114] sm:$0xf0]  ;;  %v728_v11 = vor.u32 %v855_v1, %v727_v0  ;;  %v137_v20 = vperm.slane %v1021_v2, 0 }
  0x20   :  { %498 = vmatpush.bf16.msrb.mxu2 %v780_v42  ;;  %v619_v13 = vld [vmem:[#allocation5 + $0x18] sm:$0xf]  ;;  %v828_v14 = vld [vmem:[#allocation5 + $0x20] sm:$0xf0]  ;;  %v827_v17 = vld [vmem:[#allocation5 + $0x1c] sm:$0xf]  ;;  %v744_v19 = vor.u32 %v857_v9, %v741_v10 }
  0x21   :  { %449 = vmatpush.bf16.msra.mxu0 %v644_v58  ;;  %v1024_v8 = vpack.c.bf16 %v139_v5, %v139_v5  ;;  %v715_v15 = vld [vmem:[#allocation5 + $0xd8] sm:$0xf]  ;;  %v852_v16 = vld [vmem:[#allocation5 + $0xe0] sm:$0xf0]  ;;  %v621_v18 = vld [vmem:[#allocation5 + $0x24] sm:$0xf0]  ;;  %v620_v21 = vor.u32 %v828_v14, %v619_v13  ;;  %v1030_v48 = vpack.c.bf16 %v137_v20, %v137_v20 }
  0x22   :  { %462 = vmatpush.bf16.msra.mxu1 %v740_v62  ;;  %v854_v22 = vld [vmem:[#allocation5 + $0xf4] sm:$0xf]  ;;  %v729_v23 = vld [vmem:[#allocation5 + $0xfc] sm:$0xf0]  ;;  %v716_v25 = vor.u32 %v852_v16, %v715_v15  ;;  %v624_v26 = vor.u32 %v827_v17, %v621_v18  ;;  %v825_v27 = vld [vmem:[#allocation5 + $0x8] sm:$0xf0] }
  0x23   :  { %488 = vmatpush.bf16.msra.mxu3 %v648_v63  ;;  %821 = vmatmul.msk.bf16.vlgmr.msra.gmra.mxu2 %vm441_vm0, %v1024_v8  ;;  %v607_v24 = vld [vmem:[#allocation5] sm:$0xf]  ;;  %v849_v29 = vld [vmem:[#allocation5 + $0xc8] sm:$0xf0]  ;;  %v824_v30 = vld [vmem:[#allocation5 + $0x4] sm:$0xf]  ;;  %v732_v33 = vor.u32 %v854_v22, %v729_v23 }
  0x24   :  { %499 = vmatpush.bf16.msrb.mxu2 %v768_v56  ;;  %v703_v28 = vld [vmem:[#allocation5 + $0xc0] sm:$0xf]  ;;  %v609_v31 = vld [vmem:[#allocation5 + $0xc] sm:$0xf0]  ;;  %v847_v34 = vld [vmem:[#allocation5 + $0xb8] sm:$0xf0]  ;;  %v608_v37 = vor.u32 %v825_v27, %v607_v24 }
  0x25   :  { %450 = vmatpush.bf16.msra.mxu0 %v632_v7  ;;  %v699_v32 = vld [vmem:[#allocation5 + $0xb0] sm:$0xf]  ;;  %v871_v36 = vld [vmem:[#allocation5 + $0x178] sm:$0xf0]  ;;  %v717_v39 = vld [vmem:[#allocation5 + $0xe4] sm:$0xf0]  ;;  %v704_v41 = vor.u32 %v849_v29, %v703_v28  ;;  %v612_v42 = vor.u32 %v824_v30, %v609_v31 }
  0x26   :  { %463 = vmatpush.bf16.msra.mxu1 %v728_v11  ;;  %v795_v35 = vld [vmem:[#allocation5 + $0x170] sm:$0xf]  ;;  %v851_v38 = vld [vmem:[#allocation5 + $0xdc] sm:$0xf]  ;;  %v138_v40 = vperm.slane %v1021_v2, 1  ;;  %v700_v43 = vor.u32 %v847_v34, %v699_v32  ;;  %vm579_vm2 = vcmask 253952  }
  0x27   :  { %489 = vmatpush.bf16.msra.mxu3 %v636_v12  ;;  %v796_v44 = vor.u32 %v871_v36, %v795_v35  ;;  %v687_v45 = vld [vmem:[#allocation5 + $0x98] sm:$0xf]  ;;  %v875_v46 = vld [vmem:[#allocation5 + $0x19c] sm:$0xf]  ;;  %v813_v47 = vld [vmem:[#allocation5 + $0x1a4] sm:$0xf0]  ;;  %v720_v49 = vor.u32 %v851_v38, %v717_v39 }
  0x28   :  { %500 = vmatpush.bf16.msrb.mxu2 %v756_v6  ;;  %v844_v50 = vld [vmem:[#allocation5 + $0xa0] sm:$0xf0]  ;;  %v783_v51 = vld [vmem:[#allocation5 + $0x158] sm:$0xf]  ;;  %v1032_v53 = vpack.c.bf16 %v138_v40, %v138_v40  ;;  %v705_v55 = vld [vmem:[#allocation5 + $0xcc] sm:$0xf0]  ;;  %v816_v56 = vor.u32 %v875_v46, %v813_v47 }
  0x29   :  { %451 = vmatpush.bf16.msra.mxu0 %v620_v21  ;;  %v868_v52 = vld [vmem:[#allocation5 + $0x160] sm:$0xf0]  ;;  %v819_v57 = vld [vmem:[#allocation5 + $0x1a0] sm:$0xf]  ;;  %v877_v58 = vld [vmem:[#allocation5 + $0x1a8] sm:$0xf0]  ;;  %v688_v59 = vor.u32 %v844_v50, %v687_v45 }
  0x2a   :  { %464 = vmatpush.bf16.msra.mxu1 %v716_v25  ;;  %v848_v54 = vld [vmem:[#allocation5 + $0xc4] sm:$0xf]  ;;  %v784_v60 = vor.u32 %v868_v52, %v783_v51  ;;  %v675_v61 = vld [vmem:[#allocation5 + $0x80] sm:$0xf]  ;;  %v801_v63 = vld [vmem:[#allocation5 + $0x18c] sm:$0xf0]  ;;  %v820_v4 = vor.u32 %v877_v58, %v819_v57 }
  0x2b   :  { %490 = vmatpush.bf16.msra.mxu3 %v624_v26  ;;  %v872_v62 = vld [vmem:[#allocation5 + $0x184] sm:$0xf]  ;;  %v708_v0 = vor.u32 %v848_v54, %v705_v55  ;;  %v841_v1 = vld [vmem:[#allocation5 + $0x88] sm:$0xf0]  ;;  %v771_v2 = vld [vmem:[#allocation5 + $0x140] sm:$0xf] }
  0x2c   :  { %501 = vmatpush.bf16.msrb.mxu2 %v744_v19  ;;  %v865_v3 = vld [vmem:[#allocation5 + $0x148] sm:$0xf0]  ;;  %v804_v5 = vor.u32 %v872_v62, %v801_v63  ;;  %v807_v6 = vld [vmem:[#allocation5 + $0x188] sm:$0xf]  ;;  %v874_v7 = vld [vmem:[#allocation5 + $0x190] sm:$0xf0]  ;;  %v676_v9 = vor.u32 %v841_v1, %v675_v61 }
  0x2d   :  { %452 = vmatpush.bf16.msra.mxu0 %v608_v37  ;;  %v772_v10 = vor.u32 %v865_v3, %v771_v2  ;;  %v663_v11 = vld [vmem:[#allocation5 + $0x68] sm:$0xf]  ;;  %v838_v12 = vld [vmem:[#allocation5 + $0x70] sm:$0xf0]  ;;  %v808_v15 = vor.u32 %v874_v7, %v807_v6  ;;  %v651_v18 = vld [vmem:[#allocation5 + $0x50] sm:$0xf] }
  0x2e   :  { %465 = vmatpush.bf16.msra.mxu1 %v704_v41  ;;  %v759_v13 = vld [vmem:[#allocation5 + $0x128] sm:$0xf]  ;;  %v862_v14 = vld [vmem:[#allocation5 + $0x130] sm:$0xf0]  ;;  %v664_v16 = vor.u32 %v838_v12, %v663_v11  ;;  %v835_v19 = vld [vmem:[#allocation5 + $0x58] sm:$0xf0] }
  0x2f   :  { %491 = vmatpush.bf16.msra.mxu3 %v612_v42  ;;  %v760_v17 = vor.u32 %v862_v14, %v759_v13  ;;  %v747_v20 = vld [vmem:[#allocation5 + $0x110] sm:$0xf]  ;;  %v859_v21 = vld [vmem:[#allocation5 + $0x118] sm:$0xf0]  ;;  %v652_v22 = vor.u32 %v835_v19, %v651_v18  ;;  %v639_v24 = vld [vmem:[#allocation5 + $0x38] sm:$0xf] }
  0x30   :  { %502 = vmatpush.bf16.msrb.mxu2 %v732_v33  ;;  %453 = vmatmul.bf16.vlgmr.msra.gmra.mxu0 %v1030_v48  ;;  %v748_v23 = vor.u32 %v859_v21, %v747_v20  ;;  %v832_v25 = vld [vmem:[#allocation5 + $0x40] sm:$0xf0]  ;;  %v735_v26 = vld [vmem:[#allocation5 + $0xf8] sm:$0xf]  ;;  %v627_v30 = vld [vmem:[#allocation5 + $0x20] sm:$0xf] }
  0x31   :  { %466 = vmatmul.bf16.vlgmr.msra.gmra.mxu1 %v1032_v53  ;;  %516 = vmatpush.bf16.msrb.mxu0 %v816_v56  ;;  %v856_v27 = vld [vmem:[#allocation5 + $0x100] sm:$0xf0]  ;;  %v640_v28 = vor.u32 %v832_v25, %v639_v24  ;;  %v829_v31 = vld [vmem:[#allocation5 + $0x28] sm:$0xf0]  ;;  %v723_v32 = vld [vmem:[#allocation5 + $0xe0] sm:$0xf] }
  0x32   :  { %523 = vmatpush.bf16.msrb.mxu1 %v700_v43  ;;  %492 = vmatmul.bf16.vlgmr.msra.gmra.mxu3 %v1030_v48  ;;  %v736_v29 = vor.u32 %v856_v27, %v735_v26  ;;  %v853_v33 = vld [vmem:[#allocation5 + $0xe8] sm:$0xf0]  ;;  %v628_v34 = vor.u32 %v829_v31, %v627_v30  ;;  %v615_v36 = vld [vmem:[#allocation5 + $0x8] sm:$0xf]  ;;  %v826_v37 = vld [vmem:[#allocation5 + $0x10] sm:$0xf0] }
  0x33   :  { %536 = vmatpush.bf16.msrb.mxu3 %v796_v44  ;;  %v724_v35 = vor.u32 %v853_v33, %v723_v32  ;;  %v711_v38 = vld [vmem:[#allocation5 + $0xc8] sm:$0xf]  ;;  %v850_v39 = vld [vmem:[#allocation5 + $0xd0] sm:$0xf0]  ;;  %v616_v40 = vor.u32 %v826_v37, %v615_v36  ;;  %v135_v24 = vld [vmem:[#allocation7 + $0x2] sm:$0x1] }
  0x34   :  { %503 = vmatpush.bf16.msrb.mxu2 %v720_v49  ;;  %v712_v41 = vor.u32 %v850_v39, %v711_v38  ;;  %v132_v52 = vld [vmem:[#allocation7] ss:$4 sm:$0x7]  ;;  %v134_v1 = vld [vmem:[#allocation7 + $0x1] ss:$4 sm:$0x7] }
  0x35   :  { %517 = vmatpush.bf16.msrb.mxu0 %v804_v5  ;;  %v436_v55 = vperm.slane %v132_v52, 1  ;;  %v435_v56 = vperm.slane %v132_v52, 0  ;;  %v437_v61 = vperm.slane %v132_v52, 2  ;;  %v567_v3 = vperm.slane %v134_v1, 1  ;;  %s991_s0 = smov [#allocation8]   ;;  %s594_s30 = sshll.u32 %s1050_s3, 4  ;;  %s595_s30 = int_to_ptr.hbm [resolvable:$true] %s594_s30 }
  0x36   :  { %524 = vmatpush.bf16.msrb.mxu1 %v688_v59  ;;  %v566_v6 = vperm.slane %v134_v1, 0  ;;  %v568_v14 = vperm.slane %v134_v1, 2  ;;  %s592_s2 = sshll.u32 %s991_s0, 4  ;;  %vm585_vm3 = vcmask 0   ;;  %s593_s2 = int_to_ptr.vmem [resolvable:$true] %s592_s2 }
  0x37   :  { %537 = vmatpush.bf16.msrb.mxu3 %v784_v60 }
  0x38   :  { %504 = vmatpush.bf16.msrb.mxu2 %v708_v0 }
  0x3a   :  { %525 = vmatpush.bf16.msrb.mxu1 %v676_v9 }
  0x3b   :  { %538 = vmatpush.bf16.msrb.mxu3 %v772_v10  ;;  %505 = vmatmul.bf16.vlgmr.msrb.gmra.mxu2 %v1032_v53 }
  0x3c   :  { %555 = vmatpush.bf16.msra.mxu2 %v820_v4 }
  0x3e   :  { %526 = vmatpush.bf16.msrb.mxu1 %v664_v16 }
  0x3f   :  { %539 = vmatpush.bf16.msrb.mxu3 %v760_v17 }
  0x40   :  { %556 = vmatpush.bf16.msra.mxu2 %v808_v15  ;;  %822 = vmatmul.msk.bf16.vlgmr.msrb.gmra.mxu0 %vm441_vm0, %v1024_v8 }
  0x42   :  { %527 = vmatpush.bf16.msrb.mxu1 %v652_v22 }
  0x43   :  { %540 = vmatpush.bf16.msrb.mxu3 %v748_v23 }
  0x46   :  { %528 = vmatpush.bf16.msrb.mxu1 %v640_v28 }
  0x47   :  { %541 = vmatpush.bf16.msrb.mxu3 %v736_v29 }
  0x4a   :  { %529 = vmatpush.bf16.msrb.mxu1 %v628_v34 }
  0x4b   :  { %542 = vmatpush.bf16.msrb.mxu3 %v724_v35  ;;  %823 = vmatmul.msk.bf16.vlgmr.msra.gmra.mxu2 %vm441_vm0, %v1024_v8 }
  0x4e   :  { %530 = vmatpush.bf16.msrb.mxu1 %v616_v40 }
  0x4f   :  { %543 = vmatpush.bf16.msrb.mxu3 %v712_v41 }
  0x51   :  { %531 = vmatmul.bf16.vlgmr.msrb.gmra.mxu1 %v1030_v48 }
  0x52   :  { %544 = vmatmul.bf16.vlgmr.msrb.gmra.mxu3 %v1032_v53 }
  0xa6   :  { %v480_v42 = vpop.f32.mrf.mxu2 }
  0xad   :  { %v454_v43 = vpop.f32.mrf.mxu0 }
  0xae   :  { %v467_v44 = vpop.f32.mrf.mxu1  ;;  %v482_v45 = vpop.f32.mrf.mxu2  ;;  %v455_v58 = vadd.f32 %v454_v43, %v435_v56 }
  0xb0   :  { %v468_v60 = vadd.f32 %v467_v44, %v455_v58 }
  0xb2   :  { %v481_v0 = vadd.f32 %v480_v42, %v468_v60 }
  0xb4   :  { %v562_v5 = vmax.f32 %v481_v0, 0.0 }
  0xb5   :  { %v493_v46 = vpop.f32.mrf.mxu3  ;;  %v456_v47 = vpop.f32.mrf.mxu0 }
  0xb6   :  { %v469_v49 = vpop.f32.mrf.mxu1  ;;  %v494_v8 = vadd.f32 %v493_v46, %v436_v55  ;;  %v572_v15 = vmul.f32 %v566_v6, %v562_v5 }
  0xb8   :  { %v576_v19 = vsel %vm575_vm1, %v572_v15, 0.0 }
  0xbd   :  { %v495_v51 = vpop.f32.mrf.mxu3  ;;  %v519_v54 = vpop.f32.mrf.mxu0 }
  0xbe   :  { %v506_v50 = vpop.f32.mrf.mxu2 }
  0xbf   :  { %v507_v48 = vadd.f32 %v506_v50, %v494_v8 }
  0xc1   :  { %v520_v53 = vadd.f32 %v519_v54, %v507_v48 }
  0xc3   :  { %v563_v2 = vmax.f32 %v520_v53, 0.0 }
  0xc5   :  { %v521_v59 = vpop.f32.mrf.mxu0  ;;  %v573_v9 = vmul.f32 %v567_v3, %v563_v2 }
  0xc6   :  { %v508_v57 = vpop.f32.mrf.mxu2 }
  0xc7   :  { %v577_v17 = vsel %vm575_vm1, %v573_v9, 0.0 }
  0xc8   :  { %v578_v21 = vadd.f32 %v577_v17, %v576_v19 }
  0xce   :  { %v532_v62 = vpop.f32.mrf.mxu1  ;;  %v558_v63 = vpop.f32.mrf.mxu2 }
  0xcf   :  { %v533_v4 = vadd.f32 %v532_v62, %v437_v61 }
  0xd5   :  { %v545_v7 = vpop.f32.mrf.mxu3 }
  0xd6   :  { %v546_v10 = vadd.f32 %v545_v7, %v533_v4  ;;  %v534_v11 = vpop.f32.mrf.mxu1  ;;  %v560_v12 = vpop.f32.mrf.mxu2 }
  0xd8   :  { %v559_v13 = vadd.f32 %v558_v63, %v546_v10 }
  0xda   :  { %v564_v16 = vmax.f32 %v559_v13, 0.0 }
  0xdc   :  { %v574_v18 = vmul.f32 %v568_v14, %v564_v16 }
  0xdd   :  { %v547_v20 = vpop.f32.mrf.mxu3 }
  0xde   :  { %v580_v22 = vsel %vm579_vm2, %v574_v18, 0.0 }
  0xdf   :  { %v581_v23 = vadd.f32 %v580_v22, %v578_v21 }
  0xe1   :  { %582 = vadd.xlane.f32.xlu0 %v581_v23 }
 0x154   :  { %v583_v25 = vpop.xlane.xlu0 %582 }
 0x155   :  { %v584_v26 = vadd.f32 %v583_v25, %v135_v24 }
 0x157   :  { %586 = vst.msk [vmem:[#allocation8] sm:$0x1] %vm585_vm3, %v584_v26 }
 0x158   :  { %597 = dma.vmem_to_hbm [thread:$0]  %s593_s2, 16, %s595_s30, [#allocation4]  }
 0x159   :  { %984 = dma.done.wait [#allocation4], 16  }
 0x15a   :  { %985 = vsyncadd [#allocation4], 4294967280 }
 0x15b   :  { %602 = vsyncpa [#allocation3], 1 }
 0x15c   :  { %603 = vsyncpa [#allocation6], 1 }
 0x15d   :  { %604 = vsyncpa [#allocation4], 1 }

</bundles_post_ra>
